<compile_context>
chip_gen: v7x
topology: tpu7x:2x2x1
jax: 0.10.0
libtpu: 0.0.40
codegen_flags: <defaults>
</compile_context>

<pallas_src>
import functools

import jax
import jax.numpy as jnp
from jax import lax
from jax.experimental import pallas as pl
from jax.experimental.pallas import tpu as pltpu

EPS = 1e-5  # matches the module default; a non-default eps would be threaded via partial


# --------------------------- kernels ----------------------------------------

def _norm_kernel(x_ref, w_ref, b_ref, y_ref, mean_ref, std_ref):
    """Single-pass norm: whole T per block.  x_ref/y_ref: (Bt, T, C); w/b: (1, C)."""
    x = x_ref[...].astype(jnp.float32)                     # (Bt, T, C)
    mean = jnp.mean(x, axis=1, keepdims=True)              # (Bt, 1, C)
    xc = x - mean                                          # reused for var and y
    var = jnp.mean(xc * xc, axis=1, keepdims=True)         # unbiased=False
    stdev = jnp.sqrt(var + EPS)                            # saved for denorm
    inv_std = lax.rsqrt(var + EPS)                         # EUP slot, not a VALU divide
    y = xc * inv_std
    y = y * w_ref[...] + b_ref[...]                        # (1,C) broadcasts over (Bt,T,C)
    y_ref[...] = y.astype(y_ref.dtype)
    mean_ref[...] = mean
    std_ref[...] = stdev


def _stats_kernel(x_ref, mean_ref, std_ref, *, T_total, Tt):
    """Pass 1 of the T-tiled path: accumulate sum / sumsq over the T grid axis
    directly into the resident (Bt, 1, C) output blocks, finalize at the last step."""
    t = pl.program_id(1)

    @pl.when(t == 0)
    def _():
        mean_ref[...] = jnp.zeros_like(mean_ref)
        std_ref[...] = jnp.zeros_like(std_ref)

    x = x_ref[...].astype(jnp.float32)                     # (Bt, Tt, C)
    # Mask rows past the true sequence length (last partial T block is undefined data).
    row = lax.broadcasted_iota(jnp.int32, x.shape, 1) + t * Tt
    xv = jnp.where(row < T_total, x, 0.0)
    mean_ref[...] += jnp.sum(xv, axis=1, keepdims=True)        # running sum
    std_ref[...] += jnp.sum(xv * xv, axis=1, keepdims=True)    # running sum of squares

    @pl.when(t == pl.num_programs(1) - 1)
    def _():
        inv_t = 1.0 / T_total
        mean = mean_ref[...] * inv_t
        var = jnp.maximum(std_ref[...] * inv_t - mean * mean, 0.0)
        mean_ref[...] = mean
        std_ref[...] = jnp.sqrt(var + EPS)


def _apply_norm_kernel(x_ref, mean_ref, std_ref, w_ref, b_ref, y_ref):
    """Pass 2 of the T-tiled path: pointwise normalize using precomputed stats."""
    x = x_ref[...].astype(jnp.float32)                     # (Bt, Tt, C)
    inv_std = pl.reciprocal(std_ref[...], approx=False)    # (Bt, 1, C), EUP slot
    y = (x - mean_ref[...]) * inv_std
    y = y * w_ref[...] + b_ref[...]
    y_ref[...] = y.astype(y_ref.dtype)


def _denorm_kernel(x_ref, mean_ref, std_ref, w_ref, b_ref, y_ref):
    """Pointwise denorm: x -> (x - b) / (w + eps^2) * stdev + mean."""
    x = x_ref[...].astype(jnp.float32)                     # (Bt, Tt, C)
    inv_w = pl.reciprocal(w_ref[...] + EPS * EPS, approx=False)   # (1, C)
    y = (x - b_ref[...]) * inv_w
    y = y * std_ref[...] + mean_ref[...]
    y_ref[...] = y.astype(y_ref.dtype)


# --------------------------- sizing helpers ----------------------------------

def _tpu_vmem_params():
    """Generation-aware (vmem_limit_bytes, per-block byte budget)."""
    cap = 64 * 1024 * 1024
    try:
        info = pltpu.get_tpu_info()
        cap = int(getattr(info, "vmem_capacity_bytes", cap))
    except Exception:
        pass
    vmem_limit = max(16 * 1024 * 1024, min(cap // 2, 64 * 1024 * 1024))
    block_budget = vmem_limit // 4
    return vmem_limit, block_budget


def _per_elem_bytes(dtype) -> int:
    """Approx. VMEM bytes per (Bt*Tt*C) block element:
    2x double-buffered input + 2x double-buffered output + ~3 f32 temporaries."""
    itemsize = jnp.dtype(dtype).itemsize
    return 4 * itemsize + 12


def _time_tile(T: int, C: int, per_elem: int, budget: int) -> int:
    """Largest Tt (multiple of 8, or full T) such that a (1, Tt, C) block fits budget."""
    tt = max(8, (budget // (C * per_elem)) // 8 * 8)
    return min(T, tt)


# --------------------------- wrappers ----------------------------------------

def revin_norm(x, weight, bias, *, block_budget_bytes=None, vmem_limit_bytes=None):
    """x: (B, T, C); weight/bias: (C,). Returns (y, mean, stdev) with
    y: (B, T, C) in x.dtype, mean/stdev: (B, 1, C) f32."""
    B, T, C = x.shape
    vl, bb = _tpu_vmem_params()
    vmem_limit_bytes = vmem_limit_bytes or vl
    block_budget_bytes = block_budget_bytes or bb

    per_elem = _per_elem_bytes(x.dtype)
    per_batch = T * C * per_elem

    w_row = weight.astype(jnp.float32).reshape(1, C)
    b_row = bias.astype(jnp.float32).reshape(1, C)

    if per_batch <= block_budget_bytes:
        # ---- single-pass: whole T per block, grid over batch chunks ----
        bt = max(1, min(B, block_budget_bytes // per_batch))
        n_b = pl.cdiv(B, bt)
        x_spec = pl.BlockSpec((bt, T, C), lambda i: (i, 0, 0))
        stat_spec = pl.BlockSpec((bt, 1, C), lambda i: (i, 0, 0))
        wb_spec = pl.BlockSpec((1, C), lambda i: (0, 0))
        y, mean, std = pl.pallas_call(
            _norm_kernel,
            out_shape=(
                jax.ShapeDtypeStruct((B, T, C), x.dtype),
                jax.ShapeDtypeStruct((B, 1, C), jnp.float32),
                jax.ShapeDtypeStruct((B, 1, C), jnp.float32),
            ),
            grid_spec=pltpu.PrefetchScalarGridSpec(
                num_scalar_prefetch=0,
                grid=(n_b,),
                in_specs=[x_spec, wb_spec, wb_spec],
                out_specs=[x_spec, stat_spec, stat_spec],
            ),
            compiler_params=pltpu.CompilerParams(
                dimension_semantics=("parallel",),
                vmem_limit_bytes=vmem_limit_bytes,
            ),
        )(x, w_row, b_row)
        return y, mean, std

    # ---- two-pass: T does not fit the per-block budget ----
    tt = _time_tile(T, C, per_elem, block_budget_bytes)
    bt = max(1, min(B, block_budget_bytes // (tt * C * per_elem)))
    n_b = pl.cdiv(B, bt)
    n_t = pl.cdiv(T, tt)

    x_spec = pl.BlockSpec((bt, tt, C), lambda i, j: (i, j, 0))
    stat_spec = pl.BlockSpec((bt, 1, C), lambda i, j: (i, 0, 0))
    wb_spec = pl.BlockSpec((1, C), lambda i, j: (0, 0))

    mean, std = pl.pallas_call(
        functools.partial(_stats_kernel, T_total=T, Tt=tt),
        out_shape=(
            jax.ShapeDtypeStruct((B, 1, C), jnp.float32),
            jax.ShapeDtypeStruct((B, 1, C), jnp.float32),
        ),
        grid_spec=pltpu.PrefetchScalarGridSpec(
            num_scalar_prefetch=0,
            grid=(n_b, n_t),
            in_specs=[x_spec],
            out_specs=[stat_spec, stat_spec],
        ),
        compiler_params=pltpu.CompilerParams(
            dimension_semantics=("parallel", "arbitrary"),
            vmem_limit_bytes=vmem_limit_bytes,
        ),
    )(x)

    y = pl.pallas_call(
        _apply_norm_kernel,
        out_shape=jax.ShapeDtypeStruct((B, T, C), x.dtype),
        grid_spec=pltpu.PrefetchScalarGridSpec(
            num_scalar_prefetch=0,
            grid=(n_b, n_t),
            in_specs=[x_spec, stat_spec, stat_spec, wb_spec, wb_spec],
            out_specs=x_spec,
        ),
        compiler_params=pltpu.CompilerParams(
            dimension_semantics=("parallel", "parallel"),
            vmem_limit_bytes=vmem_limit_bytes,
        ),
    )(x, mean, std, w_row, b_row)
    return y, mean, std


def revin_denorm(x, mean, stdev, weight, bias, *, block_budget_bytes=None,
                 vmem_limit_bytes=None):
    """x: (B, T, C); mean/stdev: (B, 1, C); weight/bias: (C,).  Pointwise, T-tiled."""
    B, T, C = x.shape
    vl, bb = _tpu_vmem_params()
    vmem_limit_bytes = vmem_limit_bytes or vl
    block_budget_bytes = block_budget_bytes or bb

    per_elem = _per_elem_bytes(x.dtype)
    if T * C * per_elem <= block_budget_bytes:
        tt = T
        bt = max(1, min(B, block_budget_bytes // (T * C * per_elem)))
    else:
        tt = _time_tile(T, C, per_elem, block_budget_bytes)
        bt = max(1, min(B, block_budget_bytes // (tt * C * per_elem)))
    n_b = pl.cdiv(B, bt)
    n_t = pl.cdiv(T, tt)

    x_spec = pl.BlockSpec((bt, tt, C), lambda i, j: (i, j, 0))
    stat_spec = pl.BlockSpec((bt, 1, C), lambda i, j: (i, 0, 0))
    wb_spec = pl.BlockSpec((1, C), lambda i, j: (0, 0))

    w_row = weight.astype(jnp.float32).reshape(1, C)
    b_row = bias.astype(jnp.float32).reshape(1, C)

    y = pl.pallas_call(
        _denorm_kernel,
        out_shape=jax.ShapeDtypeStruct((B, T, C), x.dtype),
        grid_spec=pltpu.PrefetchScalarGridSpec(
            num_scalar_prefetch=0,
            grid=(n_b, n_t),
            in_specs=[x_spec, stat_spec, stat_spec, wb_spec, wb_spec],
            out_specs=x_spec,
        ),
        compiler_params=pltpu.CompilerParams(
            dimension_semantics=("parallel", "parallel"),
            vmem_limit_bytes=vmem_limit_bytes,
        ),
    )(x, mean.astype(jnp.float32), stdev.astype(jnp.float32), w_row, b_row)
    return y


class RevInPallas:
    """Stateful wrapper matching the PyTorch RevIn module (affine=True, subtract_last=False)."""

    def __init__(self, num_features: int):
        self.num_features = num_features
        # deterministic init, matching nn.Parameter(torch.ones / torch.zeros)
        self.affine_weight = jnp.ones((num_features,), jnp.float32)
        self.affine_bias = jnp.zeros((num_features,), jnp.float32)
        self.mean = None
        self.stdev = None

    def __call__(self, x, mode: str):
        if mode == "norm":
            y, self.mean, self.stdev = revin_norm(x, self.affine_weight, self.affine_bias)
            return y
        elif mode == "denorm":
            return revin_denorm(x, self.mean, self.stdev,
                                self.affine_weight, self.affine_bias)
        else:
            raise NotImplementedError


# --------------------------- reference + test --------------------------------

def _ref_norm(x, w, b):
    x = x.astype(jnp.float32)
    mean = jnp.mean(x, axis=1, keepdims=True)
    var = jnp.var(x, axis=1, keepdims=True)          # ddof=0 == unbiased=False
    stdev = jnp.sqrt(var + EPS)
    return ((x - mean) / stdev) * w + b, mean, stdev


def _ref_denorm(x, mean, stdev, w, b):
    y = (x.astype(jnp.float32) - b) / (w + EPS * EPS)
    return y * stdev + mean


if __name__ == "__main__":
    # ---- test 1: module-default small shape (single-pass path) ----
    B, T, C = 2, 8, 4  # batch=2, seq=8, num_features=4
    x = jax.random.normal(jax.random.PRNGKey(0), (B, T, C), dtype=jnp.float32) * 3.0 + 1.5

    revin = RevInPallas(num_features=C)
    y = jax.block_until_ready(revin(x, "norm"))
    x_back = jax.block_until_ready(revin(y, "denorm"))

    y_ref, mean_ref, std_ref = _ref_norm(x, revin.affine_weight, revin.affine_bias)
    xb_ref = _ref_denorm(y_ref, mean_ref, std_ref, revin.affine_weight, revin.affine_bias)

    assert jnp.allclose(y, y_ref, atol=1e-5, rtol=1e-5)
    assert jnp.allclose(revin.mean, mean_ref, atol=1e-5, rtol=1e-5)
    assert jnp.allclose(revin.stdev, std_ref, atol=1e-5, rtol=1e-5)
    assert jnp.allclose(x_back, xb_ref, atol=1e-5, rtol=1e-5)
    assert jnp.allclose(x_back, x, atol=1e-4, rtol=1e-4)  # round-trip

    # ---- test 2: force the two-pass T-tiled path + multi-step grid + masked partial T block ----
    B2, T2, C2 = 4, 72, 4
    x2 = jax.random.normal(jax.random.PRNGKey(1), (B2, T2, C2), dtype=jnp.float32) * 2.0 - 0.7
    w2 = jnp.linspace(0.5, 1.5, C2, dtype=jnp.float32)
    b2 = jnp.linspace(-0.25, 0.25, C2, dtype=jnp.float32)
    small_budget = 4096  # forces tt=32 < T2 (3 T-steps incl. a masked partial one), bt=1

    y2, m2, s2 = revin_norm(x2, w2, b2, block_budget_bytes=small_budget)
    y2 = jax.block_until_ready(y2)
    x2b = jax.block_until_ready(
        revin_denorm(y2, m2, s2, w2, b2, block_budget_bytes=small_budget))

    y2r, m2r, s2r = _ref_norm(x2, w2, b2)
    assert jnp.allclose(y2, y2r, atol=1e-4, rtol=1e-4)
    assert jnp.allclose(m2, m2r, atol=1e-5, rtol=1e-5)
    assert jnp.allclose(s2, s2r, atol=1e-5, rtol=1e-5)
    assert jnp.allclose(x2b, x2, atol=1e-4, rtol=1e-4)

    # ---- test 3: bf16 I/O (dtype preserved through the kernel, f32 stats) ----
    xb16 = x2.astype(jnp.bfloat16)
    y3, m3, s3 = revin_norm(xb16, w2, b2)
    y3 = jax.block_until_ready(y3)
    assert y3.dtype == jnp.bfloat16 and m3.dtype == jnp.float32
    x3b = jax.block_until_ready(revin_denorm(y3, m3, s3, w2, b2))
    assert float(jnp.max(jnp.abs(x3b.astype(jnp.float32) - x2))) < 0.3

    print("KERNEL_OK")
</pallas_src>

<mosaic_0001>
module attributes {stable_mosaic.version = 11 : i64} {
  func.func @_norm_kernel(%arg0: i32, %arg1: memref<2x8x4xf32, #tpu.memory_space<vmem>>, %arg2: memref<1x4xf32, #tpu.memory_space<vmem>>, %arg3: memref<1x4xf32, #tpu.memory_space<vmem>>, %arg4: memref<2x8x4xf32, #tpu.memory_space<vmem>>, %arg5: memref<2x1x4xf32, #tpu.memory_space<vmem>>, %arg6: memref<2x1x4xf32, #tpu.memory_space<vmem>>) attributes {dimension_semantics = [#tpu.dimension_semantics<parallel>], iteration_bounds = array<i64: 1>, scalar_prefetch = 0 : i64, scratch_operands = 0 : i64, tpu.core_type = #tpu.core_type<tc>, window_params = [{transform_indices = @transform_0, window_bounds = array<i64: 2, 8, 4>}, {pipeline_mode = #tpu.pipeline_mode<synchronous>, transform_indices = @transform_1, window_bounds = array<i64: 1, 4>}, {pipeline_mode = #tpu.pipeline_mode<synchronous>, transform_indices = @transform_2, window_bounds = array<i64: 1, 4>}, {transform_indices = @transform_3, window_bounds = array<i64: 2, 8, 4>}, {transform_indices = @transform_4, window_bounds = array<i64: 2, 1, 4>}, {transform_indices = @transform_5, window_bounds = array<i64: 2, 1, 4>}]} {
    %c0 = arith.constant 0 : index
    %c0_0 = arith.constant 0 : index
    %c0_1 = arith.constant 0 : index
    %0 = vector.load %arg1[%c0, %c0_0, %c0_1] : memref<2x8x4xf32, #tpu.memory_space<vmem>>, vector<2x8x4xf32>
    %cst = arith.constant dense<0.000000e+00> : vector<2x4xf32>
    %1 = vector.multi_reduction <add>, %0, %cst [1] : vector<2x8x4xf32> to vector<2x4xf32>
    %2 = vector.shape_cast %1 : vector<2x4xf32> to vector<2x1x4xf32>
    %cst_2 = arith.constant 8.000000e+00 : f32
    %3 = vector.broadcast %cst_2 : f32 to vector<2x1x4xf32>
    %4 = arith.divf %2, %3 : vector<2x1x4xf32>
    %5 = vector.broadcast %4 : vector<2x1x4xf32> to vector<2x8x4xf32>
    %6 = arith.subf %0, %5 : vector<2x8x4xf32>
    %7 = arith.mulf %6, %6 : vector<2x8x4xf32>
    %cst_3 = arith.constant dense<0.000000e+00> : vector<2x4xf32>
    %8 = vector.multi_reduction <add>, %7, %cst_3 [1] : vector<2x8x4xf32> to vector<2x4xf32>
    %9 = vector.shape_cast %8 : vector<2x4xf32> to vector<2x1x4xf32>
    %cst_4 = arith.constant 8.000000e+00 : f32
    %10 = vector.broadcast %cst_4 : f32 to vector<2x1x4xf32>
    %11 = arith.divf %9, %10 : vector<2x1x4xf32>
    %cst_5 = arith.constant 9.99999974E-6 : f32
    %12 = vector.broadcast %cst_5 : f32 to vector<2x1x4xf32>
    %13 = arith.addf %11, %12 : vector<2x1x4xf32>
    %14 = math.sqrt %13 : vector<2x1x4xf32>
    %cst_6 = arith.constant 9.99999974E-6 : f32
    %15 = vector.broadcast %cst_6 : f32 to vector<2x1x4xf32>
    %16 = arith.addf %11, %15 : vector<2x1x4xf32>
    %17 = math.rsqrt %16 : vector<2x1x4xf32>
    %18 = vector.broadcast %17 : vector<2x1x4xf32> to vector<2x8x4xf32>
    %19 = arith.mulf %6, %18 : vector<2x8x4xf32>
    %c0_7 = arith.constant 0 : index
    %c0_8 = arith.constant 0 : index
    %20 = vector.load %arg2[%c0_7, %c0_8] : memref<1x4xf32, #tpu.memory_space<vmem>>, vector<1x4xf32>
    %21 = vector.shape_cast %20 : vector<1x4xf32> to vector<1x1x4xf32>
    %22 = vector.broadcast %21 : vector<1x1x4xf32> to vector<2x8x4xf32>
    %23 = arith.mulf %19, %22 : vector<2x8x4xf32>
    %c0_9 = arith.constant 0 : index
    %c0_10 = arith.constant 0 : index
    %24 = vector.load %arg3[%c0_9, %c0_10] : memref<1x4xf32, #tpu.memory_space<vmem>>, vector<1x4xf32>
    %25 = vector.shape_cast %24 : vector<1x4xf32> to vector<1x1x4xf32>
    %26 = vector.broadcast %25 : vector<1x1x4xf32> to vector<2x8x4xf32>
    %27 = arith.addf %23, %26 : vector<2x8x4xf32>
    %c0_11 = arith.constant 0 : index
    %c0_12 = arith.constant 0 : index
    %c0_13 = arith.constant 0 : index
    %28 = vector.load %arg4[%c0_11, %c0_12, %c0_13] : memref<2x8x4xf32, #tpu.memory_space<vmem>>, vector<2x8x4xf32>
    tpu.vector_store %arg4[%c0_11, %c0_12, %c0_13], %27 {strides = array<i32>} : memref<2x8x4xf32, #tpu.memory_space<vmem>>, vector<2x8x4xf32>,
    %c0_14 = arith.constant 0 : index
    %c0_15 = arith.constant 0 : index
    %c0_16 = arith.constant 0 : index
    %29 = vector.load %arg5[%c0_14, %c0_15, %c0_16] : memref<2x1x4xf32, #tpu.memory_space<vmem>>, vector<2x1x4xf32>
    tpu.vector_store %arg5[%c0_14, %c0_15, %c0_16], %4 {strides = array<i32>} : memref<2x1x4xf32, #tpu.memory_space<vmem>>, vector<2x1x4xf32>,
    %c0_17 = arith.constant 0 : index
    %c0_18 = arith.constant 0 : index
    %c0_19 = arith.constant 0 : index
    %30 = vector.load %arg6[%c0_17, %c0_18, %c0_19] : memref<2x1x4xf32, #tpu.memory_space<vmem>>, vector<2x1x4xf32>
    tpu.vector_store %arg6[%c0_17, %c0_18, %c0_19], %14 {strides = array<i32>} : memref<2x1x4xf32, #tpu.memory_space<vmem>>, vector<2x1x4xf32>,
    return
  }
  func.func @transform_0(%arg0: i32) -> (i32, i32, i32) {
    %c0_i32 = arith.constant 0 : i32
    %c0_i32_0 = arith.constant 0 : i32
    %c0_i32_1 = arith.constant 0 : i32
    return %arg0, %c0_i32, %c0_i32_0 : i32, i32, i32
  }
  func.func @transform_1(%arg0: i32) -> (i32, i32) {
    %c0_i32 = arith.constant 0 : i32
    %c0_i32_0 = arith.constant 0 : i32
    %c0_i32_1 = arith.constant 0 : i32
    return %c0_i32, %c0_i32_0 : i32, i32
  }
  func.func @transform_2(%arg0: i32) -> (i32, i32) {
    %c0_i32 = arith.constant 0 : i32
    %c0_i32_0 = arith.constant 0 : i32
    %c0_i32_1 = arith.constant 0 : i32
    return %c0_i32, %c0_i32_0 : i32, i32
  }
  func.func @transform_3(%arg0: i32) -> (i32, i32, i32) {
    %c0_i32 = arith.constant 0 : i32
    %c0_i32_0 = arith.constant 0 : i32
    %c0_i32_1 = arith.constant 0 : i32
    return %arg0, %c0_i32, %c0_i32_0 : i32, i32, i32
  }
  func.func @transform_4(%arg0: i32) -> (i32, i32, i32) {
    %c0_i32 = arith.constant 0 : i32
    %c0_i32_0 = arith.constant 0 : i32
    %c0_i32_1 = arith.constant 0 : i32
    return %arg0, %c0_i32, %c0_i32_0 : i32, i32, i32
  }
  func.func @transform_5(%arg0: i32) -> (i32, i32, i32) {
    %c0_i32 = arith.constant 0 : i32
    %c0_i32_0 = arith.constant 0 : i32
    %c0_i32_1 = arith.constant 0 : i32
    return %arg0, %c0_i32, %c0_i32_0 : i32, i32, i32
  }
}

</mosaic_0001>

<bundles_post_ra>
// kernel: tpu_custom_call.1
= control target key start
LH: loop header
LB: loop body
LE: loop exit
PB: predicated region body
PF: predicated region fallthrough
CT: control target
= control target key end

     0   :  { %11 = vsyncpa [#allocation3], 0  ;;  %vm21_vm0 = vcmask 31744   ;;  %s291_s0 = inlined_call_operand.vmem [shape: f32[2,8,4], index: 0, kind: input, shape index: {}]   ;;  %s292_s1 = inlined_call_operand.vmem [shape: f32[1,4], index: 1, kind: input, shape index: {}]   ;;  %s293_s2 = inlined_call_operand.vmem [shape: f32[1,4], index: 2, kind: input, shape index: {}]   ;;  %s294_s3 = inlined_call_operand.vmem [shape: f32[2,8,4], index: 3, kind: output, shape index: {0}]   ;;  %s295_s4 = inlined_call_operand.hbm [shape: f32[2,1,4], index: 4, kind: output, shape index: {1}]   ;;  %s296_s5 = inlined_call_operand.hbm [shape: f32[2,1,4], index: 5, kind: output, shape index: {2}]  }
   0x1   :  { %v19_v0 = vld [vmem:[%s291_s0] sm:$0xff]  ;;  %v20_v1 = vld [vmem:[%s291_s0 + $0x8] sm:$0xff] }
   0x2   :  { %v22_v2 = vsel %vm21_vm0, %v19_v0, 0.0  ;;  %v29_v3 = vsel %vm21_vm0, %v20_v1, 0.0 }
   0x3   :  { %v23_v4 = vrot.slane %v22_v2, 4  ;;  %v30_v5 = vrot.slane %v29_v3, 4 }
   0x4   :  { %12 = vsyncpa [#allocation5], 0  ;;  %s198_s22 = smov [#allocation2]   ;;  %vm99_vm1 = vcmask 24576  }
   0x5   :  { %v24_v6 = vadd.f32 %v23_v4, %v22_v2  ;;  %v31_v7 = vadd.f32 %v30_v5, %v29_v3  ;;  %s111_s23 = sshll.u32 %s198_s22, 4  ;;  %s112_s23 = int_to_ptr.vmem [resolvable:$true] %s111_s23 }
   0x6   :  { %s150_s0 = scalar_lea.vmem %s112_s23, 32  ;;  %p155_p1 = scmp.lt.s32.totalorder %s112_s23, %s112_s23 }
   0x7   :  { %v25_v8 = vrot.slane %v24_v6, 2  ;;  %v32_v9 = vrot.slane %v31_v7, 2  ;;  %p151_p0 = scmp.ne.s32.totalorder %s112_s23, %s150_s0  ;;  %p156_p2 = scmp.lt.s32.totalorder %s150_s0, %s150_s0 }
   0x9   :  { %v26_v10 = vadd.f32 %v25_v8, %v24_v6  ;;  %v33_v11 = vadd.f32 %v32_v9, %v31_v7  ;;  %p157_p3 = por %p156_p2, %p155_p1 }
   0xb   :  { %v27_v12 = vrot.slane %v26_v10, 1  ;;  %v34_v13 = vrot.slane %v33_v11, 1  ;;  %p158_p4 = pnand %p157_p3, %p151_p0 }
   0xd   :  { %v28_v14 = vadd.f32 %v27_v12, %v26_v10  ;;  %v35_v15 = vadd.f32 %v34_v13, %v33_v11 }
   0xf   :  { %v37_v16 = vmul.f32 0.125, %v28_v14  ;;  %v38_v17 = vmul.f32 0.125, %v35_v15 }
  0x11   :  { %v39_v18 = vsub.f32 %v19_v0, %v37_v16  ;;  %100 = vst.msk [vmem:[#allocation2] sm:$0x1] %vm99_vm1, %v37_v16  ;;  %v40_v19 = vsub.f32 %v20_v1, %v38_v17  ;;  %101 = vst.msk [vmem:[#allocation2 + $0x1] sm:$0x1] %vm99_vm1, %v38_v17 }
  0x12   :  { %161 = shalt.err (!%p158_p4)
}
  0x13   :  { %s162_s26 = scalar_lea.hbm %s295_s4, 32 }
  0x14   :  { %p163_p5 = scmp.ne.s32.totalorder %s295_s4, %s162_s26  ;;  %p166_p6 = scmp.lt.u32.totalorder %s162_s26, %s295_s4 }
  0x16   :  { %p168_p7 = pnand %p166_p6, %p163_p5 }
  0x18   :  { %171 = shalt.err (!%p168_p7)
}
  0x19   :  { %s199_s6 = smov 16   ;;  %s200_s7 = smov 1   ;;  %v41_v20 = vmul.f32 %v39_v18, %v39_v18  ;;  %v42_v21 = vmul.f32 %v40_v19, %v40_v19  ;;  %v140_v42 = vld [vmem:[%s292_s1] ss:$0 sm:$0xff] }
  0x1a   :  { %117 = dma.vmem_to_hbm [thread:$0]  %s112_s23, 32, %s295_s4, [#allocation3], %s199_s6, %s199_s6, %s200_s7  }
  0x1b   :  { %v43_v22 = vsel %vm21_vm0, %v41_v20, 0.0  ;;  %v50_v23 = vsel %vm21_vm0, %v42_v21, 0.0  ;;  %s201_s11 = smov [#allocation4]   ;;  %v141_v48 = vld [vmem:[%s293_s2] ss:$0 sm:$0xff] }
  0x1c   :  { %v44_v24 = vrot.slane %v43_v22, 4  ;;  %v51_v25 = vrot.slane %v50_v23, 4  ;;  %s123_s12 = sshll.u32 %s201_s11, 4  ;;  %s124_s12 = int_to_ptr.vmem [resolvable:$true] %s123_s12 }
  0x1d   :  { %s172_s2 = scalar_lea.vmem %s124_s12, 32  ;;  %p177_p9 = scmp.lt.s32.totalorder %s124_s12, %s124_s12 }
  0x1e   :  { %v45_v26 = vadd.f32 %v44_v24, %v43_v22  ;;  %v52_v27 = vadd.f32 %v51_v25, %v50_v23  ;;  %p173_p8 = scmp.ne.s32.totalorder %s124_s12, %s172_s2  ;;  %p178_p10 = scmp.lt.s32.totalorder %s172_s2, %s172_s2 }
  0x20   :  { %v46_v28 = vrot.slane %v45_v26, 2  ;;  %v53_v29 = vrot.slane %v52_v27, 2  ;;  %p179_p11 = por %p178_p10, %p177_p9 }
  0x22   :  { %v47_v30 = vadd.f32 %v46_v28, %v45_v26  ;;  %v54_v31 = vadd.f32 %v53_v29, %v52_v27  ;;  %p180_p12 = pnand %p179_p11, %p173_p8 }
  0x24   :  { %v48_v32 = vrot.slane %v47_v30, 1  ;;  %v55_v33 = vrot.slane %v54_v31, 1 }
  0x26   :  { %v49_v34 = vadd.f32 %v48_v32, %v47_v30  ;;  %v56_v35 = vadd.f32 %v55_v33, %v54_v31 }
  0x28   :  { %v57_v36 = vmul.f32 0.125, %v49_v34  ;;  %v58_v37 = vmul.f32 0.125, %v56_v35 }
  0x2a   :  { %v59_v38 = vadd.f32 1e-05, %v57_v36  ;;  %v60_v39 = vadd.f32 1e-05, %v58_v37 }
  0x2c   :  { %146 = vrsqrt.f32 %v59_v38  ;;  %vm63_vm2 = vcmp.eq.f32.partialorder %v59_v38, inf  ;;  %vm65_vm3 = vcmp.eq.f32.partialorder %v59_v38, 0.0  ;;  %v66_v41 = vand.u32 2147483648, %v59_v38 }
  0x2d   :  { %148 = vrsqrt.f32 %v60_v39  ;;  %vm70_vm4 = vcmp.eq.f32.partialorder %v60_v39, inf  ;;  %v73_v45 = vand.u32 2147483648, %v60_v39  ;;  %vm72_vm5 = vcmp.eq.f32.partialorder %v60_v39, 0.0 }
  0x36   :  { %v147_v40 = vpop.eup %146 }
  0x37   :  { %v149_v43 = vpop.eup %148  ;;  %v62_v44 = vmul.f32 %v147_v40, %v59_v38  ;;  %v77_v46 = vmul.f32 %v147_v40, %v39_v18 }
  0x38   :  { %v69_v47 = vmul.f32 %v149_v43, %v60_v39  ;;  %v78_v49 = vmul.f32 %v149_v43, %v40_v19 }
  0x39   :  { %v64_v50 = vsel %vm63_vm2, %v59_v38, %v62_v44  ;;  %v86_v51 = vmul.f32 %v140_v42, %v77_v46 }
  0x3a   :  { %v67_v52 = vsel %vm65_vm3, %v66_v41, %v64_v50  ;;  %v71_v53 = vsel %vm70_vm4, %v60_v39, %v69_v47  ;;  %v87_v54 = vmul.f32 %v140_v42, %v78_v49 }
  0x3b   :  { %102 = vst.msk [vmem:[#allocation4] sm:$0x1] %vm99_vm1, %v67_v52  ;;  %v74_v55 = vsel %vm72_vm5, %v73_v45, %v71_v53  ;;  %v95_v56 = vadd.f32 %v141_v48, %v86_v51 }
  0x3c   :  { %103 = vst.msk [vmem:[#allocation4 + $0x1] sm:$0x1] %vm99_vm1, %v74_v55  ;;  %v96_v57 = vadd.f32 %v141_v48, %v87_v54 }
  0x3d   :  { %97 = vst.msk [vmem:[%s294_s3] sm:$0xff] %vm21_vm0, %v95_v56 }
  0x3e   :  { %183 = shalt.err (!%p180_p12)
}
  0x3f   :  { %s184_s18 = scalar_lea.hbm %s296_s5, 32 }
  0x40   :  { %p185_p13 = scmp.ne.s32.totalorder %s296_s5, %s184_s18  ;;  %p188_p0 = scmp.lt.u32.totalorder %s184_s18, %s296_s5 }
  0x42   :  { %p190_p1 = pnand %p188_p0, %p185_p13 }
  0x44   :  { %193 = shalt.err (!%p190_p1)
}
  0x45   :  { %129 = dma.vmem_to_hbm [thread:$0]  %s124_s12, 32, %s296_s5, [#allocation5], %s199_s6, %s199_s6, %s200_s7  }
  0x46   :  { %98 = vst.msk [vmem:[%s294_s3 + $0x8] sm:$0xff] %vm21_vm0, %v96_v57 }
  0x47   :  { %194 = dma.done.wait [#allocation3], 32  }
  0x48   :  { %195 = vsyncadd [#allocation3], 4294967264 }
  0x49   :  { %196 = dma.done.wait [#allocation5], 32  }
  0x4a   :  { %197 = vsyncadd [#allocation5], 4294967264 }
  0x4b   :  { %138 = vsyncpa [#allocation3], 1 }
  0x4c   :  { %139 = vsyncpa [#allocation5], 1 }

</bundles_post_ra>
